<compile_context>
chip_gen: v5e
topology: v5e:2x2
jax: 0.10.0
libtpu: 0.0.40
codegen_flags: <defaults>
</compile_context>

<pallas_src>
import jax
import jax.numpy as jnp
from jax.experimental import pallas as pl
from jax.experimental.pallas import tpu as pltpu

COS_VAL = 1.75
_MAX_TN = 2048          # H-tile cap (multiple of 128)
_TARGET_TILE_BYTES = 4 * 1024 * 1024


def _round_up(n, m):
    return ((n + m - 1) // m) * m


def wave_act_kernel(x_ref, inv_alpha_ref, beta_ref, o_ref):
    x = x_ref[...].astype(jnp.float32)                  # (TM, TN)
    inv_alpha = inv_alpha_ref[...]                      # (1, TN), f32
    beta = beta_ref[...]                                # (1, TN), f32
    z = (x - beta) * inv_alpha
    out = jnp.cos(COS_VAL * z) * jnp.exp(-0.5 * (z * z))
    o_ref[...] = out.astype(o_ref.dtype)


def wave_act(x, alpha, beta, *, tm=None, tn=None):
    """x: (..., H); alpha, beta: (H,) — matches the module's in_shape=[H]."""
    orig_shape = x.shape
    H = orig_shape[-1]
    rows = 1
    for d in orig_shape[:-1]:
        rows *= d

    itemsize = jnp.dtype(x.dtype).itemsize

    # H tile: full H when it fits (valid even if H % 128 != 0, since the block
    # equals the full dim); otherwise a 128-multiple cap.
    if tn is None:
        tn = H if H <= _MAX_TN else _MAX_TN

    # Row tile: target ~4 MiB per x buffer, multiple of 8, never taller than
    # the (sublane-aligned) row count.
    if tm is None:
        tm = _TARGET_TILE_BYTES // max(1, tn * itemsize)
        tm = max(8, min(8192, (tm // 8) * 8))
    tm = max(8, min(tm, _round_up(rows, 8)))

    # Metadata-only reshape (no copy); params precomputed once in f32.
    x2 = x.reshape(rows, H)
    inv_a2 = (1.0 / alpha.astype(jnp.float32)).reshape(1, H)
    b2 = beta.astype(jnp.float32).reshape(1, H)

    grid = (pl.cdiv(rows, tm), pl.cdiv(H, tn))

    # Double-buffered working set: 2x(in + out) tiles + 2x2 param blocks,
    # plus headroom; clamped so it is safe on v5e/v6e/v7x.
    working = 2 * 2 * tm * tn * itemsize + 2 * 2 * 2 * tn * 4
    vmem_bytes = int(min(max(working + (8 << 20), 16 << 20), 48 << 20))

    out2 = pl.pallas_call(
        wave_act_kernel,
        out_shape=jax.ShapeDtypeStruct((rows, H), x.dtype),
        grid_spec=pltpu.PrefetchScalarGridSpec(
            num_scalar_prefetch=0,
            grid=grid,
            in_specs=[
                pl.BlockSpec((tm, tn), lambda i, j: (i, j)),   # x (streamed)
                pl.BlockSpec((1, tn), lambda i, j: (0, j)),    # inv_alpha
                pl.BlockSpec((1, tn), lambda i, j: (0, j)),    # beta
            ],
            out_specs=pl.BlockSpec((tm, tn), lambda i, j: (i, j)),
        ),
        compiler_params=pltpu.CompilerParams(
            dimension_semantics=("parallel", "parallel"),
            vmem_limit_bytes=vmem_bytes,
        ),
    )(x2, inv_a2, b2)

    return out2.reshape(orig_shape)


def wave_act_ref(x, alpha, beta):
    z = (x - beta) / alpha
    return jnp.cos(COS_VAL * z) * jnp.exp(-(z ** 2) / 2)


if __name__ == "__main__":
    key = jax.random.PRNGKey(0)
    kx1, kx2, kx3, ka, kb = jax.random.split(key, 5)

    # Case 1: module-default parameter init (ones / zeros), H = 128.
    B, S, H = 2, 8, 128
    x = jax.random.normal(kx1, (B, S, H), dtype=jnp.float32)
    alpha = jnp.ones((H,), dtype=jnp.float32)
    beta = jnp.zeros((H,), dtype=jnp.float32)
    out = jax.block_until_ready(wave_act(x, alpha, beta))
    ref = wave_act_ref(x, alpha, beta)
    assert out.shape == x.shape
    assert jnp.allclose(out, ref, atol=1e-5, rtol=1e-5)

    # Case 2: non-trivial alpha/beta and a row count that needs a masked
    # partial last block (rows = 15, no padding copies).
    B2, S2 = 3, 5
    x2 = jax.random.normal(kx2, (B2, S2, H), dtype=jnp.float32)
    alpha2 = 0.5 + jax.random.uniform(ka, (H,), dtype=jnp.float32)
    beta2 = 0.1 * jax.random.normal(kb, (H,), dtype=jnp.float32)
    out2 = jax.block_until_ready(wave_act(x2, alpha2, beta2))
    ref2 = wave_act_ref(x2, alpha2, beta2)
    assert out2.shape == x2.shape
    assert jnp.allclose(out2, ref2, atol=1e-5, rtol=1e-5)

    # Case 3: H not a multiple of 128 (block equals the full last dim).
    B3, S3, H3 = 2, 7, 96
    x3 = jax.random.normal(kx3, (B3, S3, H3), dtype=jnp.float32)
    alpha3 = jnp.ones((H3,), dtype=jnp.float32)
    beta3 = jnp.zeros((H3,), dtype=jnp.float32)
    out3 = jax.block_until_ready(wave_act(x3, alpha3, beta3))
    ref3 = wave_act_ref(x3, alpha3, beta3)
    assert out3.shape == x3.shape
    assert jnp.allclose(out3, ref3, atol=1e-5, rtol=1e-5)

    print("KERNEL_OK")
</pallas_src>

<mosaic_0001>
module attributes {stable_mosaic.version = 11 : i64} {
  func.func @wave_act_kernel(%arg0: i32, %arg1: i32, %arg2: memref<16x128xf32, #tpu.memory_space<vmem>>, %arg3: memref<1x128xf32, #tpu.memory_space<vmem>>, %arg4: memref<1x128xf32, #tpu.memory_space<vmem>>, %arg5: memref<16x128xf32, #tpu.memory_space<vmem>>) attributes {dimension_semantics = [#tpu.dimension_semantics<parallel>, #tpu.dimension_semantics<parallel>], iteration_bounds = array<i64: 1, 1>, scalar_prefetch = 0 : i64, scratch_operands = 0 : i64, tpu.core_type = #tpu.core_type<tc>, window_params = [{transform_indices = @transform_0, window_bounds = array<i64: 16, 128>}, {transform_indices = @transform_1, window_bounds = array<i64: 1, 128>}, {transform_indices = @transform_2, window_bounds = array<i64: 1, 128>}, {transform_indices = @transform_3, window_bounds = array<i64: 16, 128>}]} {
    %c0 = arith.constant 0 : index
    %c0_0 = arith.constant 0 : index
    %0 = vector.load %arg2[%c0, %c0_0] : memref<16x128xf32, #tpu.memory_space<vmem>>, vector<16x128xf32>
    %c0_1 = arith.constant 0 : index
    %c0_2 = arith.constant 0 : index
    %1 = vector.load %arg3[%c0_1, %c0_2] : memref<1x128xf32, #tpu.memory_space<vmem>>, vector<1x128xf32>
    %c0_3 = arith.constant 0 : index
    %c0_4 = arith.constant 0 : index
    %2 = vector.load %arg4[%c0_3, %c0_4] : memref<1x128xf32, #tpu.memory_space<vmem>>, vector<1x128xf32>
    %3 = vector.broadcast %2 : vector<1x128xf32> to vector<16x128xf32>
    %4 = arith.subf %0, %3 : vector<16x128xf32>
    %5 = vector.broadcast %1 : vector<1x128xf32> to vector<16x128xf32>
    %6 = arith.mulf %4, %5 : vector<16x128xf32>
    %cst = arith.constant 1.750000e+00 : f32
    %7 = vector.broadcast %cst : f32 to vector<16x128xf32>
    %8 = arith.mulf %7, %6 : vector<16x128xf32>
    %9 = math.cos %8 : vector<16x128xf32>
    %10 = arith.mulf %6, %6 : vector<16x128xf32>
    %cst_5 = arith.constant -5.000000e-01 : f32
    %11 = vector.broadcast %cst_5 : f32 to vector<16x128xf32>
    %12 = arith.mulf %11, %10 : vector<16x128xf32>
    %13 = math.exp %12 : vector<16x128xf32>
    %14 = arith.mulf %9, %13 : vector<16x128xf32>
    %c0_6 = arith.constant 0 : index
    %c0_7 = arith.constant 0 : index
    %15 = vector.load %arg5[%c0_6, %c0_7] : memref<16x128xf32, #tpu.memory_space<vmem>>, vector<16x128xf32>
    tpu.vector_store %arg5[%c0_6, %c0_7], %14 {strides = array<i32>} : memref<16x128xf32, #tpu.memory_space<vmem>>, vector<16x128xf32>,
    return
  }
  func.func @transform_0(%arg0: i32, %arg1: i32) -> (i32, i32) {
    %c0_i32 = arith.constant 0 : i32
    return %arg0, %arg1 : i32, i32
  }
  func.func @transform_1(%arg0: i32, %arg1: i32) -> (i32, i32) {
    %c0_i32 = arith.constant 0 : i32
    %c0_i32_0 = arith.constant 0 : i32
    return %c0_i32, %arg1 : i32, i32
  }
  func.func @transform_2(%arg0: i32, %arg1: i32) -> (i32, i32) {
    %c0_i32 = arith.constant 0 : i32
    %c0_i32_0 = arith.constant 0 : i32
    return %c0_i32, %arg1 : i32, i32
  }
  func.func @transform_3(%arg0: i32, %arg1: i32) -> (i32, i32) {
    %c0_i32 = arith.constant 0 : i32
    return %arg0, %arg1 : i32, i32
  }
}

</mosaic_0001>

<bundles_post_ra>
// kernel: tpu_custom_call.1
= control target key start
LH: loop header
LB: loop body
LE: loop exit
PB: predicated region body
PF: predicated region fallthrough
CT: control target
= control target key end

     0   :  { %8 = vsyncpa [#allocation3], 0  ;;  %s744_s0 = inlined_call_operand.hbm [shape: f32[16,128], index: 0, kind: input, shape index: {}]   ;;  %s745_s1 = inlined_call_operand.hbm [shape: f32[1,128], index: 1, kind: input, shape index: {}]   ;;  %s746_s2 = inlined_call_operand.vmem [shape: f32[1,128], index: 2, kind: input, shape index: {}]   ;;  %s747_s3 = inlined_call_operand.hbm [shape: f32[16,128], index: 3, kind: output, shape index: {}]  }
   0x1   :  { %9 = vsyncpa [#allocation6], 0 }
   0x2   :  { %10 = vsyncpa [#allocation4], 0  ;;  %s15_s14 = sshll.u32 %s744_s0, 4  ;;  %s503_s15 = smov [#allocation2]   ;;  %s16_s14 = int_to_ptr.hbm [resolvable:$true] %s15_s14 }
   0x3   :  { %s17_s16 = sshll.u32 %s503_s15, 4  ;;  %s29_s19 = sshll.u32 %s745_s1, 4  ;;  %s18_s16 = int_to_ptr.vmem [resolvable:$true] %s17_s16  ;;  %s30_s19 = int_to_ptr.hbm [resolvable:$true] %s29_s19 }
   0x4   :  { %s504_s20 = smov 128   ;;  %s505_s21 = smov 8  }
   0x5   :  { %23 = dma.hbm_to_vmem [thread:$0]  %s16_s14, 256, %s18_s16, [#allocation3], %s504_s20, %s504_s20, %s505_s21  }
   0x6   :  { %s506_s22 = smov [#allocation5]  }
   0x7   :  { %s31_s23 = sshll.u32 %s506_s22, 4  ;;  %s32_s23 = int_to_ptr.vmem [resolvable:$true] %s31_s23 }
   0x8   :  { %34 = dma.hbm_to_vmem [thread:$0]  %s30_s19, 16, %s32_s23, [#allocation6]  }
   0x9   :  { %497 = dma.done.wait [#allocation3], 256  }
   0xa   :  { %498 = vsyncadd [#allocation3], 4294967040 }
   0xb   :  { %499 = dma.done.wait [#allocation6], 16  }
   0xc   :  { %500 = vsyncadd [#allocation6], 4294967280  ;;  %v45_v0 = vld [vmem:[#allocation2] sm:$0xff]  ;;  %v46_v1 = vld [vmem:[#allocation2 + $0x8] sm:$0xff]  ;;  %v507_v31 = vmov 683565275  }
   0xd   :  { %v419_v2 = vld [vmem:[%s746_s2] ss:$0 sm:$0xff]  ;;  %v420_v3 = vld [vmem:[#allocation5] ss:$0 sm:$0xff]  ;;  %v508_v33 = vmov 2475754826  }
   0xe   :  { %v52_v4 = vsub.f32 %v45_v0, %v419_v2  ;;  %v53_v5 = vsub.f32 %v46_v1, %v419_v2  ;;  %v509_v35 = vmov 2131351028   ;;  %v510_v37 = vmov 2102212464   ;;  %s514_s1 = smov [#allocation7]   ;;  %s387_s27 = sshll.u32 %s747_s3, 4  ;;  %s388_s27 = int_to_ptr.hbm [resolvable:$true] %s387_s27 }
   0xf   :  { %v511_v39 = vmov 920167782   ;;  %v512_v48 = vmov 1326507024   ;;  %s385_s2 = sshll.u32 %s514_s1, 4  ;;  %s386_s2 = int_to_ptr.vmem [resolvable:$true] %s385_s2 }
  0x10   :  { %v547_v6 = vmul.f32 %v420_v3, %v52_v4  ;;  %v549_v7 = vmul.f32 %v420_v3, %v53_v5 }
  0x12   :  { %v552_v8 = vmul.f32 1.75, %v547_v6  ;;  %v555_v9 = vmul.f32 1.75, %v549_v7 }
  0x14   :  { %v61_v10 = vand.u32 2147483647, %v552_v8  ;;  %v64_v11 = vand.u32 2139095040, %v552_v8  ;;  %v215_v12 = vand.u32 2147483647, %v555_v9  ;;  %v218_v13 = vand.u32 2139095040, %v555_v9 }
  0x16   :  { %v65_v14 = vshrl.u32 %v64_v11, 23  ;;  %v68_v15 = vand.u32 8388607, %v61_v10  ;;  %v219_v16 = vshrl.u32 %v218_v13, 23  ;;  %v222_v20 = vand.u32 8388607, %v215_v12 }
  0x18   :  { %v401_v17 = vadd.s32 4294967169, %v65_v14  ;;  %v69_v18 = vor.u32 8388608, %v68_v15  ;;  %v404_v19 = vadd.s32 4294967169, %v219_v16  ;;  %v223_v25 = vor.u32 8388608, %v222_v20 }
  0x1a   :  { %v71_v21 = vadd.s32 1, %v401_v17  ;;  %v225_v22 = vadd.s32 1, %v404_v19  ;;  %v565_v24 = vshll.u32 %v69_v18, 8  ;;  %v575_v42 = vshll.u32 %v223_v25, 8 }
  0x1c   :  { %vm72_vm0 = vcmp.gt.s32.totalorder %v71_v21, 0  ;;  %vm226_vm1 = vcmp.gt.s32.totalorder %v225_v22, 0  ;;  %v110_v41 = vand.u32 65535, %v565_v24  ;;  %v111_v46 = vshrl.u32 %v565_v24, 16 }
  0x1d   :  { %v73_v23 = vsel %vm72_vm0, %v71_v21, 0  ;;  %v227_v27 = vsel %vm226_vm1, %v225_v22, 0 }
  0x1e   :  { %v75_v26 = vand.u32 31, %v73_v23  ;;  %v567_v28 = vshrl.u32 %v73_v23, 5  ;;  %v569_v29 = vand.u32 31, %v227_v27  ;;  %v593_v59 = vshrl.u32 %v227_v27, 5 }
  0x20   :  { %v76_v30 = vsub.s32 32, %v75_v26  ;;  %v78_v32 = vshll.u32 %v507_v31, %v75_v26  ;;  %v81_v34 = vshll.u32 %v508_v33, %v75_v26  ;;  %v84_v36 = vshll.u32 %v509_v35, %v75_v26 }
  0x21   :  { %v87_v38 = vshll.u32 %v510_v37, %v75_v26  ;;  %v90_v40 = vshll.u32 %v511_v39, %v75_v26  ;;  %vm93_vm2 = vcmp.lt.s32.totalorder %v567_v28, 1  ;;  %vm96_vm3 = vcmp.lt.s32.totalorder %v567_v28, 4 }
  0x22   :  { %v79_v43 = vshrl.u32 %v508_v33, %v76_v30  ;;  %v82_v44 = vshrl.u32 %v509_v35, %v76_v30  ;;  %v85_v45 = vshrl.u32 %v510_v37, %v76_v30  ;;  %v88_v47 = vshrl.u32 %v511_v39, %v76_v30 }
  0x23   :  { %v91_v49 = vshrl.u32 %v512_v48, %v76_v30  ;;  %v584_v53 = vsub.s32 32, %v569_v29  ;;  %v77_v54 = vshrl.u32 %v507_v31, %v76_v30  ;;  %vm95_vm4 = vcmp.lt.s32.totalorder %v567_v28, 3 }
  0x24   :  { %v80_v50 = vor.u32 %v79_v43, %v78_v32  ;;  %v83_v51 = vor.u32 %v82_v44, %v81_v34  ;;  %v86_v52 = vor.u32 %v85_v45, %v84_v36  ;;  %v89_v55 = vor.u32 %v88_v47, %v87_v38 }
  0x25   :  { %v92_v56 = vor.u32 %v91_v49, %v90_v40  ;;  %vm94_vm5 = vcmp.lt.s32.totalorder %v567_v28, 2  ;;  %v232_v62 = vshll.u32 %v507_v31, %v569_v29  ;;  %v235_v63 = vshll.u32 %v508_v33, %v569_v29 }
  0x26   :  { %v101_v57 = vsel %vm93_vm2, %v80_v50, %v83_v51  ;;  %v105_v58 = vsel %vm93_vm2, %v83_v51, %v86_v52  ;;  %v102_v60 = vsel %vm96_vm3, %v89_v55, 920167782  ;;  %v98_v0 = vsel %vm96_vm3, %v86_v52, 2102212464 }
  0x27   :  { %v106_v61 = vsel %vm96_vm3, %v92_v56, 1326507024  ;;  %v103_v1 = vsel %vm95_vm4, %v86_v52, %v102_v60  ;;  %v233_v3 = vshrl.u32 %v508_v33, %v584_v53  ;;  %v97_v4 = vsel %vm93_vm2, %v77_v54, %v80_v50 }
  0x28   :  { %v107_v2 = vsel %vm95_vm4, %v89_v55, %v106_v61  ;;  %v104_v5 = vsel %vm94_vm5, %v101_v57, %v103_v1  ;;  %v236_v13 = vshrl.u32 %v509_v35, %v584_v53  ;;  %v99_v18 = vsel %vm95_vm4, %v83_v51, %v98_v0 }
  0x29   :  { %v108_v11 = vsel %vm94_vm5, %v105_v58, %v107_v2  ;;  %v134_v16 = vand.u32 65535, %v104_v5  ;;  %v135_v17 = vshrl.u32 %v104_v5, 16  ;;  %v618_v19 = vor.u32 %v233_v3, %v232_v62 }
  0x2a   :  { %v112_v14 = vand.u32 65535, %v108_v11  ;;  %v113_v15 = vshrl.u32 %v108_v11, 16  ;;  %v620_v20 = vor.u32 %v236_v13, %v235_v63  ;;  %v238_v21 = vshll.u32 %v509_v35, %v569_v29 }
  0x2b   :  { %v239_v26 = vshrl.u32 %v510_v37, %v584_v53  ;;  %v136_v30 = vmul.u32 %v134_v16, %v110_v41  ;;  %v137_v32 = vmul.u32 %v135_v17, %v110_v41  ;;  %v138_v33 = vmul.u32 %v134_v16, %v111_v46 }
  0x2c   :  { %v114_v22 = vmul.u32 %v112_v14, %v110_v41  ;;  %v115_v23 = vmul.u32 %v113_v15, %v110_v41  ;;  %v116_v25 = vmul.u32 %v112_v14, %v111_v46  ;;  %v117_v27 = vmul.u32 %v113_v15, %v111_v46 }
  0x2d   :  { %v139_v40 = vmul.u32 %v135_v17, %v111_v46  ;;  %v140_v44 = vshll.u32 %v137_v32, 16  ;;  %v141_v45 = vshrl.u32 %v137_v32, 16  ;;  %v142_v47 = vshll.u32 %v138_v33, 16 }
  0x2e   :  { %v118_v34 = vshll.u32 %v115_v23, 16  ;;  %v119_v36 = vshrl.u32 %v115_v23, 16  ;;  %v120_v38 = vshll.u32 %v116_v25, 16  ;;  %v121_v43 = vshrl.u32 %v116_v25, 16 }
  0x2f   :  { %v143_v49 = vshrl.u32 %v138_v33, 16  ;;  %v241_v50 = vshll.u32 %v510_v37, %v569_v29  ;;  %v513_v51 = vmov 0   ;;  %vm144_vm7 = vc.u32 %v136_v30, %v140_v44 }
  0x30   :  { %vm122_vm6 = vc.u32 %v114_v22, %v118_v34  ;;  %v124_v35 = vadd.s32 %v118_v34, %v114_v22  ;;  %v146_v41 = vadd.s32 %v140_v44, %v136_v30  ;;  %v242_v54 = vshrl.u32 %v511_v39, %v584_v53 }
  0x31   :  { %v123_v52 = vsel %vm122_vm6, 1, %v513_v51  ;;  %v145_v46 = vsel %vm144_vm7, 1, %v513_v51  ;;  %v244_v56 = vshll.u32 %v511_v39, %v569_v29  ;;  %v240_v37 = vor.u32 %v239_v26, %v238_v21 }
  0x32   :  { %v125_v55 = vadd.s32 %v123_v52, %v117_v27  ;;  %vm126_vm8 = vc.u32 %v124_v35, %v120_v38  ;;  %v147_v58 = vadd.s32 %v145_v46, %v139_v40  ;;  %vm148_vm9 = vc.u32 %v146_v41, %v142_v47 }
  0x33   :  { %v127_v57 = vsel %vm126_vm8, 1, %v513_v51  ;;  %v149_v61 = vsel %vm148_vm9, 1, %v513_v51  ;;  %v243_v62 = vor.u32 %v242_v54, %v241_v50  ;;  %v245_v63 = vshrl.u32 %v512_v48, %v584_v53 }
  0x34   :  { %v129_v60 = vadd.s32 %v127_v57, %v125_v55  ;;  %v637_v0 = vadd.s32 %v146_v41, %v142_v47  ;;  %v151_v1 = vadd.s32 %v149_v61, %v147_v58  ;;  %vm247_vm10 = vcmp.lt.s32.totalorder %v593_v59, 1 }
  0x35   :  { %vm249_vm11 = vcmp.lt.s32.totalorder %v593_v59, 3  ;;  %v246_v39 = vor.u32 %v245_v63, %v244_v56  ;;  %vm248_vm12 = vcmp.lt.s32.totalorder %v593_v59, 2  ;;  %vm250_vm13 = vcmp.lt.s32.totalorder %v593_v59, 4 }
  0x36   :  { %v130_v29 = vadd.s32 %v129_v60, %v119_v36  ;;  %v100_v2 = vsel %vm94_vm5, %v97_v4, %v99_v18  ;;  %v152_v3 = vadd.s32 %v151_v1, %v141_v45  ;;  %v255_v48 = vsel %vm247_vm10, %v618_v19, %v620_v20 }
  0x37   :  { %v256_v5 = vsel %vm250_vm13, %v243_v62, 920167782  ;;  %v259_v14 = vsel %vm247_vm10, %v620_v20, %v240_v37  ;;  %v264_v28 = vand.u32 65535, %v575_v42  ;;  %v260_v16 = vsel %vm250_vm13, %v246_v39, 1326507024 }
  0x38   :  { %v651_v11 = vadd.s32 %v130_v29, %v121_v43  ;;  %v257_v13 = vsel %vm249_vm11, %v240_v37, %v256_v5  ;;  %v153_v4 = vadd.s32 %v152_v3, %v143_v49  ;;  %v265_v17 = vshrl.u32 %v575_v42, 16 }
  0x39   :  { %v258_v15 = vsel %vm248_vm12, %v255_v48, %v257_v13  ;;  %v154_v18 = vmul.u32 %v565_v24, %v100_v2  ;;  %v261_v21 = vsel %vm249_vm11, %v243_v62, %v260_v16  ;;  %v231_v33 = vshrl.u32 %v507_v31, %v584_v53 }
  0x3a   :  { %vm156_vm14 = vc.u32 %v651_v11, %v637_v0  ;;  %v288_v22 = vand.u32 65535, %v258_v15  ;;  %v157_v23 = vadd.s32 1, %v153_v4  ;;  %v262_v25 = vsel %vm248_vm12, %v259_v14, %v261_v21 }
  0x3b   :  { %v289_v26 = vshrl.u32 %v258_v15, 16  ;;  %v266_v27 = vand.u32 65535, %v262_v25  ;;  %v267_v30 = vshrl.u32 %v262_v25, 16  ;;  %v252_v35 = vsel %vm250_vm13, %v240_v37, 2102212464 }
  0x3c   :  { %v158_v32 = vsel %vm156_vm14, %v157_v23, %v153_v4  ;;  %v292_v24 = vmul.u32 %v288_v22, %v265_v17  ;;  %v290_v43 = vmul.u32 %v288_v22, %v264_v28  ;;  %v251_v52 = vsel %vm247_vm10, %v231_v33, %v618_v19 }
  0x3d   :  { %v291_v34 = vmul.u32 %v289_v26, %v264_v28  ;;  %v159_v36 = vadd.s32 %v158_v32, %v154_v18  ;;  %v268_v38 = vmul.u32 %v266_v27, %v264_v28  ;;  %v269_v40 = vmul.u32 %v267_v30, %v264_v28 }
  0x3e   :  { %v270_v44 = vmul.u32 %v266_v27, %v265_v17  ;;  %v271_v49 = vmul.u32 %v267_v30, %v265_v17  ;;  %v293_v31 = vmul.u32 %v289_v26, %v265_v17  ;;  %v296_v53 = vshll.u32 %v292_v24, 16 }
  0x3f   :  { %v294_v45 = vshll.u32 %v291_v34, 16  ;;  %v160_v47 = vadd.s32 536870912, %v159_v36  ;;  %v272_v50 = vshll.u32 %v269_v40, 16  ;;  %v253_v46 = vsel %vm249_vm11, %v620_v20, %v252_v35 }
  0x40   :  { %v274_v41 = vshll.u32 %v270_v44, 16  ;;  %v273_v19 = vshrl.u32 %v269_v40, 16  ;;  %v295_v62 = vshrl.u32 %v291_v34, 16  ;;  %v275_v29 = vshrl.u32 %v270_v44, 16 }
  0x41   :  { %v678_v54 = vshrl.u32 %v160_v47, 30  ;;  %vm276_vm15 = vc.u32 %v268_v38, %v272_v50  ;;  %v278_v55 = vadd.s32 %v272_v50, %v268_v38  ;;  %vm298_vm0 = vc.u32 %v290_v43, %v294_v45 }
  0x42   :  { %v277_v56 = vsel %vm276_vm15, 1, %v513_v51  ;;  %v299_v57 = vsel %vm298_vm0, 1, %v513_v51  ;;  %v300_v58 = vadd.s32 %v294_v45, %v290_v43  ;;  %v297_v2 = vshrl.u32 %v292_v24, 16 }
  0x43   :  { %v162_v37 = vshll.u32 %v678_v54, 30  ;;  %v279_v60 = vadd.s32 %v277_v56, %v271_v49  ;;  %vm280_vm1 = vc.u32 %v278_v55, %v274_v41  ;;  %v301_v63 = vadd.s32 %v299_v57, %v293_v31 }
  0x44   :  { %v281_v61 = vsel %vm280_vm1, 1, %v513_v51  ;;  %vm302_vm2 = vc.u32 %v300_v58, %v296_v53  ;;  %v304_v13 = vadd.s32 %v300_v58, %v296_v53  ;;  %v254_v14 = vsel %vm248_vm12, %v251_v52, %v253_v46 }
  0x45   :  { %v163_v1 = vsub.s32 %v159_v36, %v162_v37  ;;  %v283_v39 = vadd.s32 %v281_v61, %v279_v60  ;;  %v303_v20 = vsel %vm302_vm2, 1, %v513_v51  ;;  %v308_v18 = vmul.u32 %v575_v42, %v254_v14 }
  0x46   :  { %v305_v3 = vadd.s32 %v303_v20, %v301_v63  ;;  %v155_v51 = vadd.s32 %v637_v0, %v651_v11  ;;  %vm63_vm7 = vcmp.lt.s32.totalorder %v552_v8, 0  ;;  %vm699_vm8 = vcmp.le.f32.partialorder %v61_v10, 0.7853982 }
  0x47   :  { %vm164_vm3 = vcmp.lt.s32.totalorder %v163_v1, 0  ;;  %v165_v48 = vsub.s32 0, %v163_v1  ;;  %v284_v5 = vadd.s32 %v283_v39, %v273_v19  ;;  %v185_v31 = vsub.s32 4, %v678_v54 }
  0x48   :  { %v306_v28 = vadd.s32 %v305_v3, %v295_v62  ;;  %v369_v10 = vmul.f32 %v547_v6, %v547_v6  ;;  %vm217_vm11 = vcmp.lt.s32.totalorder %v555_v9, 0  ;;  %vm719_vm13 = vcmp.le.f32.partialorder %v215_v12, 0.7853982 }
  0x49   :  { %v166_v4 = vsel %vm164_vm3, %v165_v48, %v163_v1  ;;  %v285_v15 = vadd.s32 %v284_v5, %v275_v29  ;;  %v186_v60 = vsel %vm63_vm7, %v185_v31, %v678_v54  ;;  %vm204_vm15 = vweird.f32 %v552_v8 }
  0x4a   :  { %v167_v16 = vclz %v166_v4  ;;  %v307_v17 = vadd.s32 %v306_v28, %v297_v2  ;;  %v371_v29 = vmul.f32 -0.5, %v369_v10  ;;  %v188_v20 = vsel %vm699_vm8, 0, %v186_v60 }
  0x4b   :  { %vm310_vm4 = vc.u32 %v285_v15, %v304_v13  ;;  %v309_v46 = vadd.s32 %v304_v13, %v285_v15  ;;  %v205_v28 = vand.u32 3, %v188_v20  ;;  %vm358_vm3 = vweird.f32 %v555_v9 }
  0x4c   :  { %v402_v21 = vadd.s32 4294967294, %v167_v16  ;;  %v311_v22 = vadd.s32 1, %v307_v17  ;;  %v373_v14 = vmul.f32 1.442695, %v371_v29 }
  0x4d   :  { %vm210_vm10 = vcmp.eq.s32.totalorder %v205_v28, 2  ;;  %vm207_vm12 = vcmp.eq.s32.totalorder %v205_v28, 0  ;;  %vm206_vm14 = vcmp.lt.s32.totalorder %v205_v28, 2 }
  0x4e   :  { %vm403_vm5 = vcmp.lt.s32.totalorder %v402_v21, 0  ;;  %v312_v23 = vsel %vm310_vm4, %v311_v22, %v307_v17  ;;  %421 = vpow2.f32 %v373_v14 }
  0x4f   :  { %v170_v25 = vsel %vm403_vm5, 0, %v402_v21  ;;  %v313_v26 = vadd.s32 %v312_v23, %v308_v18 }
  0x50   :  { %v171_v27 = vsub.s32 32, %v170_v25  ;;  %v172_v59 = vshll.u32 %v163_v1, %v170_v25  ;;  %v175_v30 = vsub.s32 4294967266, %v170_v25 }
  0x51   :  { %v314_v32 = vadd.s32 536870912, %v313_v26 }
  0x52   :  { %v173_v33 = vshrl.u32 %v155_v51, %v171_v27  ;;  %v176_v34 = vadd.s32 127, %v175_v30 }
  0x53   :  { %v693_v24 = vshrl.u32 %v314_v32, 30 }
  0x54   :  { %v174_v36 = vor.u32 %v173_v33, %v172_v59  ;;  %v177_v42 = vshll.u32 %v176_v34, 23  ;;  %v422_v32 = vpop.eup %421 }
  0x55   :  { %v316_v38 = vshll.u32 %v693_v24, 30  ;;  %v339_v34 = vsub.s32 4, %v693_v24 }
  0x56   :  { %v178_v40 = vor.u32 4788187, %v177_v42  ;;  %v181_v43 = vcvt.s32.f32 %v174_v36 }
  0x57   :  { %v317_v44 = vsub.s32 %v313_v26, %v316_v38  ;;  %v370_v38 = vmul.f32 %v549_v7, %v549_v7 }
  0x58   :  { %v179_v0 = vand.u32 2147483647, %v178_v40 }
  0x59   :  { %vm318_vm6 = vcmp.lt.s32.totalorder %v317_v44, 0  ;;  %v319_v11 = vsub.s32 0, %v317_v44 }
  0x5a   :  { %v182_v45 = vmul.f32 %v181_v43, %v179_v0  ;;  %v340_v0 = vsel %vm217_vm11, %v339_v34, %v693_v24 }
  0x5b   :  { %v320_v47 = vsel %vm318_vm6, %v319_v11, %v317_v44  ;;  %v342_v35 = vsel %vm719_vm13, 0, %v340_v0 }
  0x5c   :  { %v183_v49 = vxor.u32 2147483648, %v182_v45  ;;  %v321_v50 = vclz %v320_v47  ;;  %v372_v47 = vmul.f32 -0.5, %v370_v38  ;;  %v359_v31 = vand.u32 3, %v342_v35 }
  0x5e   :  { %v184_v52 = vsel %vm63_vm7, %v183_v49, %v182_v45  ;;  %v405_v41 = vadd.s32 4294967294, %v321_v50  ;;  %v375_v7 = vmul.f32 1.442695, %v372_v47  ;;  %vm364_vm0 = vcmp.eq.s32.totalorder %v359_v31, 2 }
  0x5f   :  { %v187_v53 = vsel %vm699_vm8, %v552_v8, %v184_v52  ;;  %vm361_vm1 = vcmp.eq.s32.totalorder %v359_v31, 0  ;;  %vm360_vm2 = vcmp.lt.s32.totalorder %v359_v31, 2 }
  0x60   :  { %v189_v55 = vmul.f32 %v187_v53, %v187_v53  ;;  %vm406_vm9 = vcmp.lt.s32.totalorder %v405_v41, 0  ;;  %423 = vpow2.f32 %v375_v7 }
  0x61   :  { %v324_v56 = vsel %vm406_vm9, 0, %v405_v41 }
  0x62   :  { %v190_v57 = vmul.f32 -0.001358992, %v189_v55  ;;  %v197_v58 = vmul.f32 -0.00019511016, %v189_v55  ;;  %v325_v37 = vsub.s32 32, %v324_v56  ;;  %v326_v19 = vshll.u32 %v317_v44, %v324_v56 }
  0x63   :  { %v329_v61 = vsub.s32 4294967266, %v324_v56 }
  0x64   :  { %v191_v62 = vadd.f32 0.041655596, %v190_v57  ;;  %v198_v63 = vadd.f32 0.008332121, %v197_v58  ;;  %v327_v1 = vshrl.u32 %v309_v46, %v325_v37 }
  0x65   :  { %v330_v39 = vadd.s32 127, %v329_v61 }
  0x66   :  { %v192_v2 = vmul.f32 %v191_v62, %v189_v55  ;;  %v199_v6 = vmul.f32 %v198_v63, %v189_v55  ;;  %v328_v3 = vor.u32 %v327_v1, %v326_v19  ;;  %v424_v37 = vpop.eup %423 }
  0x67   :  { %v331_v48 = vshll.u32 %v330_v39, 23 }
  0x68   :  { %v193_v5 = vadd.f32 -0.4999988, %v192_v2  ;;  %v200_v13 = vadd.f32 -0.16666654, %v199_v6  ;;  %v335_v15 = vcvt.s32.f32 %v328_v3 }
  0x69   :  { %v332_v4 = vor.u32 4788187, %v331_v48 }
  0x6a   :  { %v194_v54 = vmul.f32 %v193_v5, %v189_v55  ;;  %v201_v16 = vmul.f32 %v200_v13, %v189_v55 }
  0x6b   :  { %v333_v17 = vand.u32 2147483647, %v332_v4 }
  0x6c   :  { %v195_v18 = vadd.f32 1.0, %v194_v54  ;;  %v202_v21 = vadd.f32 1.0, %v201_v16 }
  0x6d   :  { %v336_v22 = vmul.f32 %v335_v15, %v333_v17 }
  0x6e   :  { %v203_v51 = vmul.f32 %v202_v21, %v187_v53  ;;  %v211_v23 = vxor.u32 2147483648, %v195_v18 }
  0x6f   :  { %v337_v26 = vxor.u32 2147483648, %v336_v22 }
  0x70   :  { %v208_v27 = vxor.u32 2147483648, %v203_v51  ;;  %v212_v59 = vsel %vm210_vm10, %v211_v23, %v203_v51 }
  0x71   :  { %v338_v30 = vsel %vm217_vm11, %v337_v26, %v336_v22 }
  0x72   :  { %v209_v33 = vsel %vm207_vm12, %v195_v18, %v208_v27  ;;  %v341_v12 = vsel %vm719_vm13, %v555_v9, %v338_v30 }
  0x73   :  { %v213_v36 = vsel %vm206_vm14, %v209_v33, %v212_v59  ;;  %v343_v42 = vmul.f32 %v341_v12, %v341_v12 }
  0x74   :  { %v214_v40 = vsel %vm204_vm15, nan, %v213_v36 }
  0x75   :  { %v344_v43 = vmul.f32 -0.001358992, %v343_v42  ;;  %v351_v44 = vmul.f32 -0.00019511016, %v343_v42  ;;  %v377_v8 = vmul.f32 %v422_v32, %v214_v40 }
  0x77   :  { %v345_v11 = vadd.f32 0.041655596, %v344_v43  ;;  %v352_v45 = vadd.f32 0.008332121, %v351_v44  ;;  %379 = vst [vmem:[#allocation7] sm:$0xff] %v377_v8 }
  0x79   :  { %v346_v49 = vmul.f32 %v345_v11, %v343_v42  ;;  %v353_v50 = vmul.f32 %v352_v45, %v343_v42 }
  0x7b   :  { %v347_v52 = vadd.f32 -0.4999988, %v346_v49  ;;  %v354_v41 = vadd.f32 -0.16666654, %v353_v50 }
  0x7d   :  { %v348_v53 = vmul.f32 %v347_v52, %v343_v42  ;;  %v355_v55 = vmul.f32 %v354_v41, %v343_v42 }
  0x7f   :  { %v349_v46 = vadd.f32 1.0, %v348_v53  ;;  %v356_v10 = vadd.f32 1.0, %v355_v55 }
  0x81   :  { %v357_v24 = vmul.f32 %v356_v10, %v341_v12  ;;  %v365_v56 = vxor.u32 2147483648, %v349_v46 }
  0x83   :  { %v362_v57 = vxor.u32 2147483648, %v357_v24  ;;  %v366_v58 = vsel %vm364_vm0, %v365_v56, %v357_v24 }
  0x85   :  { %v363_v19 = vsel %vm361_vm1, %v349_v46, %v362_v57 }
  0x86   :  { %v367_v60 = vsel %vm360_vm2, %v363_v19, %v366_v58 }
  0x87   :  { %v368_v61 = vsel %vm358_vm3, nan, %v367_v60 }
  0x88   :  { %v378_v62 = vmul.f32 %v424_v37, %v368_v61 }
  0x8a   :  { %380 = vst [vmem:[#allocation7 + $0x8] sm:$0xff] %v378_v62 }
  0x8b   :  { %393 = dma.vmem_to_hbm [thread:$0]  %s386_s2, 256, %s388_s27, [#allocation4], %s504_s20, %s504_s20, %s505_s21  }
  0x8c   :  { %501 = dma.done.wait [#allocation4], 256  }
  0x8d   :  { %502 = vsyncadd [#allocation4], 4294967040 }
  0x8e   :  { %398 = vsyncpa [#allocation3], 1 }
  0x8f   :  { %399 = vsyncpa [#allocation6], 1 }
  0x90   :  { %400 = vsyncpa [#allocation4], 1 }

</bundles_post_ra>
